<compile_context>
chip_gen: v5e
topology: v5e:2x2
jax: 0.10.0
libtpu: 0.0.40
codegen_flags: <defaults>
</compile_context>

<pallas_src>
import functools
import math

import jax
import jax.numpy as jnp
from jax import lax
from jax.experimental import pallas as pl
from jax.experimental.pallas import tpu as pltpu


def _bag_of_attentions_kernel(scalars_ref, x_ref, wqkv_ref, bqkv_ref,
                              wo_ref, bo_ref, wc1_ref, bc1_ref,
                              wc2_ref, bc2_ref, ws_ref, o_ref, *, num_heads):
    # scalars_ref (SMEM, f32[3]): [w1_softmax, w2_softmax, spatial_bias]
    # x_ref: (1, S, E)   wqkv_ref: (E, 3E)   bqkv_ref: (1, 3E)
    # wo_ref: (E, E) (w0 pre-folded)   bo_ref: (1, E) (w0 pre-folded)
    # wc1_ref: (E, E//8)  bc1_ref: (1, E//8)  wc2_ref: (E//8, E)  bc2_ref: (1, E)
    # ws_ref: (1, E)   o_ref: (1, S, E)
    x = x_ref[0]                                   # (S, E) f32
    S, E = x.shape
    hd = E // num_heads
    scale = 1.0 / math.sqrt(hd)

    # ---- multi-head self-attention (eval mode; dropout is a no-op) ----
    qkv = jnp.dot(x, wqkv_ref[...], preferred_element_type=jnp.float32) + bqkv_ref[...]
    q = qkv[:, 0 * E:1 * E]
    k = qkv[:, 1 * E:2 * E]
    v = qkv[:, 2 * E:3 * E]

    ctx_heads = []
    for h in range(num_heads):                     # static unroll (small head count)
        lo, hi = h * hd, (h + 1) * hd
        qh, kh, vh = q[:, lo:hi], k[:, lo:hi], v[:, lo:hi]
        # q @ k^T via dot_general contracting the head dim of both operands.
        s = lax.dot_general(qh, kh, (((1,), (1,)), ((), ())),
                            preferred_element_type=jnp.float32) * scale  # (S, S)
        s = s - jnp.max(s, axis=-1, keepdims=True)
        p = jnp.exp(s)
        p = p / jnp.sum(p, axis=-1, keepdims=True)
        ctx_heads.append(jnp.dot(p, vh, preferred_element_type=jnp.float32))
    ctx = jnp.concatenate(ctx_heads, axis=-1)      # (S, E)
    # softmax(mix)[0] is already folded into wo/bo by the wrapper.
    mha_term = jnp.dot(ctx, wo_ref[...], preferred_element_type=jnp.float32) + bo_ref[...]

    # ---- channel attention: shared MLP over the stacked avg/max pooled tokens ----
    pooled = jnp.concatenate(
        [jnp.mean(x, axis=0, keepdims=True), jnp.max(x, axis=0, keepdims=True)],
        axis=0)                                    # (2, E)
    h1 = jnp.maximum(
        jnp.dot(pooled, wc1_ref[...], preferred_element_type=jnp.float32) + bc1_ref[...],
        0.0)                                       # (2, E//8)
    h2 = jax.nn.sigmoid(
        jnp.dot(h1, wc2_ref[...], preferred_element_type=jnp.float32) + bc2_ref[...])
    channel_w = h2[0:1, :] + h2[1:2, :]            # (1, E)

    # ---- spatial attention: Linear(E, 1) + sigmoid as elementwise mul + lane reduce ----
    sp_logit = jnp.sum(x * ws_ref[...], axis=-1, keepdims=True) + scalars_ref[2]
    spatial_w = jax.nn.sigmoid(sp_logit)           # (S, 1)

    w1 = scalars_ref[0]
    w2 = scalars_ref[1]
    out = mha_term + (w1 * channel_w) * x + (w2 * spatial_w) * x
    o_ref[0] = out.astype(o_ref.dtype)


def bag_of_attentions(x, in_proj_w, in_proj_b, out_w, out_b,
                      c1_w, c1_b, c2_w, c2_b, sp_w, sp_b, mix_w,
                      *, num_heads):
    """x: (B, S, E) f32.  Parameter layouts follow PyTorch conventions:
    in_proj_w (3E, E), in_proj_b (3E,), out_w (E, E), out_b (E,),
    c1_w (E//8, E), c1_b (E//8,), c2_w (E, E//8), c2_b (E,),
    sp_w (1, E), sp_b (1,), mix_w (3,).  Returns (B, S, E)."""
    B, S, E = x.shape
    H8 = c1_w.shape[0]
    hd = E // num_heads

    # Wrapper-side folding (free): softmax the mix weights, fold w0 into out-proj.
    w_soft = jax.nn.softmax(mix_w.astype(jnp.float32))
    w0, w1, w2 = w_soft[0], w_soft[1], w_soft[2]

    w_qkv = in_proj_w.T                                   # (E, 3E)
    b_qkv = in_proj_b.reshape(1, 3 * E)
    wo = w0 * out_w.T                                     # (E, E), w0 folded in
    bo = (w0 * out_b).reshape(1, E)
    wc1 = c1_w.T                                          # (E, H8)
    bc1 = c1_b.reshape(1, H8)
    wc2 = c2_w.T                                          # (H8, E)
    bc2 = c2_b.reshape(1, E)
    ws_row = sp_w.reshape(1, E)
    scalars = jnp.stack([w1, w2, sp_b.reshape(())]).astype(jnp.float32)  # (3,)

    # Advisory cost estimate for the XLA scheduler.
    flops = (2 * B * S * E * 3 * E            # fused QKV projection
             + 4 * B * S * S * E              # QK^T and PV over all heads
             + 2 * B * S * E * E              # output projection
             + 8 * B * E * H8                 # channel MLP (2 pooled rows)
             + 2 * B * S * E                  # spatial gate dot
             + 6 * B * S * E)                 # gating muls + combine
    transcendentals = B * (num_heads * S * S + 2 * E + S)
    bytes_accessed = 4 * (x.size + w_qkv.size + b_qkv.size + wo.size + bo.size
                          + wc1.size + bc1.size + wc2.size + bc2.size
                          + ws_row.size + scalars.size + B * S * E)

    kernel = functools.partial(_bag_of_attentions_kernel, num_heads=num_heads)

    return pl.pallas_call(
        kernel,
        out_shape=jax.ShapeDtypeStruct((B, S, E), x.dtype),
        grid_spec=pl.GridSpec(
            grid=(B,),
            in_specs=[
                pl.BlockSpec(memory_space=pltpu.MemorySpace.SMEM),   # scalars
                pl.BlockSpec((1, S, E), lambda b: (b, 0, 0)),        # x
                pl.BlockSpec((E, 3 * E), lambda b: (0, 0)),          # w_qkv
                pl.BlockSpec((1, 3 * E), lambda b: (0, 0)),          # b_qkv
                pl.BlockSpec((E, E), lambda b: (0, 0)),              # wo (w0 folded)
                pl.BlockSpec((1, E), lambda b: (0, 0)),              # bo (w0 folded)
                pl.BlockSpec((E, H8), lambda b: (0, 0)),             # wc1
                pl.BlockSpec((1, H8), lambda b: (0, 0)),             # bc1
                pl.BlockSpec((H8, E), lambda b: (0, 0)),             # wc2
                pl.BlockSpec((1, E), lambda b: (0, 0)),              # bc2
                pl.BlockSpec((1, E), lambda b: (0, 0)),              # spatial weight row
            ],
            out_specs=pl.BlockSpec((1, S, E), lambda b: (b, 0, 0)),
        ),
        compiler_params=pltpu.CompilerParams(
            dimension_semantics=("parallel",)),
        cost_estimate=pl.CostEstimate(
            flops=int(flops),
            transcendentals=int(transcendentals),
            bytes_accessed=int(bytes_accessed)),
    )(scalars, x, w_qkv, b_qkv, wo, bo, wc1, bc1, wc2, bc2, ws_row)


def _reference(x, in_proj_w, in_proj_b, out_w, out_b,
               c1_w, c1_b, c2_w, c2_b, sp_w, sp_b, mix_w, *, num_heads):
    """Pure-JAX reference mirroring the PyTorch module (eval mode)."""
    B, S, E = x.shape
    hd = E // num_heads

    qkv = jnp.einsum('bse,fe->bsf', x, in_proj_w) + in_proj_b       # (B, S, 3E)
    q, k, v = jnp.split(qkv, 3, axis=-1)

    def split_heads(t):
        return t.reshape(B, S, num_heads, hd).transpose(0, 2, 1, 3)  # (B, H, S, hd)

    qh, kh, vh = split_heads(q), split_heads(k), split_heads(v)
    scores = jnp.einsum('bhqd,bhkd->bhqk', qh, kh) / jnp.sqrt(float(hd))
    p = jax.nn.softmax(scores, axis=-1)
    ctx = jnp.einsum('bhqk,bhkd->bhqd', p, vh).transpose(0, 2, 1, 3).reshape(B, S, E)
    mha_out = jnp.einsum('bse,fe->bsf', ctx, out_w) + out_b

    avg_p = jnp.mean(x, axis=1)          # (B, E)
    max_p = jnp.max(x, axis=1)           # (B, E)

    def channel_mlp(t):
        h = jax.nn.relu(t @ c1_w.T + c1_b)
        return jax.nn.sigmoid(h @ c2_w.T + c2_b)

    channel_w = (channel_mlp(avg_p) + channel_mlp(max_p))[:, None, :]  # (B, 1, E)
    channel_out = x * channel_w

    spatial_w = jax.nn.sigmoid(jnp.einsum('bse,oe->bso', x, sp_w) + sp_b)  # (B, S, 1)
    spatial_out = x * spatial_w

    w = jax.nn.softmax(mix_w)
    return w[0] * mha_out + w[1] * channel_out + w[2] * spatial_out


if __name__ == "__main__":
    # Small shapes consistent with the module: (batch, seq, embed_dim) with
    # embed_dim divisible by num_heads and by 8 (channel MLP bottleneck).
    batch, seq, embed_dim, n_heads = 2, 8, 32, 4
    hidden = embed_dim // 8

    key = jax.random.PRNGKey(0)
    keys = jax.random.split(key, 12)

    x = jax.random.normal(keys[0], (batch, seq, embed_dim), dtype=jnp.float32)

    bnd_e = 1.0 / math.sqrt(embed_dim)
    bnd_h = 1.0 / math.sqrt(hidden)
    in_proj_w = jax.random.uniform(keys[1], (3 * embed_dim, embed_dim),
                                   minval=-bnd_e, maxval=bnd_e, dtype=jnp.float32)
    in_proj_b = jax.random.uniform(keys[2], (3 * embed_dim,),
                                   minval=-bnd_e, maxval=bnd_e, dtype=jnp.float32)
    out_w = jax.random.uniform(keys[3], (embed_dim, embed_dim),
                               minval=-bnd_e, maxval=bnd_e, dtype=jnp.float32)
    out_b = jax.random.uniform(keys[4], (embed_dim,),
                               minval=-bnd_e, maxval=bnd_e, dtype=jnp.float32)
    c1_w = jax.random.uniform(keys[5], (hidden, embed_dim),
                              minval=-bnd_e, maxval=bnd_e, dtype=jnp.float32)
    c1_b = jax.random.uniform(keys[6], (hidden,),
                              minval=-bnd_e, maxval=bnd_e, dtype=jnp.float32)
    c2_w = jax.random.uniform(keys[7], (embed_dim, hidden),
                              minval=-bnd_h, maxval=bnd_h, dtype=jnp.float32)
    c2_b = jax.random.uniform(keys[8], (embed_dim,),
                              minval=-bnd_h, maxval=bnd_h, dtype=jnp.float32)
    sp_w = jax.random.uniform(keys[9], (1, embed_dim),
                              minval=-bnd_e, maxval=bnd_e, dtype=jnp.float32)
    sp_b = jax.random.uniform(keys[10], (1,),
                              minval=-bnd_e, maxval=bnd_e, dtype=jnp.float32)
    # nn.Parameter(torch.ones(3)) at init; use distinct random values here so the
    # learned-mix path is actually exercised by the correctness check.
    mix_w = jax.random.normal(keys[11], (3,), dtype=jnp.float32)

    out = bag_of_attentions(x, in_proj_w, in_proj_b, out_w, out_b,
                            c1_w, c1_b, c2_w, c2_b, sp_w, sp_b, mix_w,
                            num_heads=n_heads)
    out = jax.block_until_ready(out)

    ref = _reference(x, in_proj_w, in_proj_b, out_w, out_b,
                     c1_w, c1_b, c2_w, c2_b, sp_w, sp_b, mix_w,
                     num_heads=n_heads)

    assert out.shape == (batch, seq, embed_dim), out.shape
    max_err = float(jnp.max(jnp.abs(out - ref)))
    assert jnp.allclose(out, ref, atol=1e-4, rtol=1e-4), max_err

    print("KERNEL_OK")
</pallas_src>

<mosaic_0001>
module attributes {stable_mosaic.version = 11 : i64} {
  func.func @_bag_of_attentions_kernel(%arg0: i32, %arg1: memref<3xf32, #tpu.memory_space<smem>>, %arg2: memref<1x8x32xf32, #tpu.memory_space<vmem>>, %arg3: memref<32x96xf32, #tpu.memory_space<vmem>>, %arg4: memref<1x96xf32, #tpu.memory_space<vmem>>, %arg5: memref<32x32xf32, #tpu.memory_space<vmem>>, %arg6: memref<1x32xf32, #tpu.memory_space<vmem>>, %arg7: memref<32x4xf32, #tpu.memory_space<vmem>>, %arg8: memref<1x4xf32, #tpu.memory_space<vmem>>, %arg9: memref<4x32xf32, #tpu.memory_space<vmem>>, %arg10: memref<1x32xf32, #tpu.memory_space<vmem>>, %arg11: memref<1x32xf32, #tpu.memory_space<vmem>>, %arg12: memref<1x8x32xf32, #tpu.memory_space<vmem>>) attributes {dimension_semantics = [#tpu.dimension_semantics<parallel>], iteration_bounds = array<i64: 2>, scalar_prefetch = 0 : i64, scratch_operands = 0 : i64, tpu.core_type = #tpu.core_type<tc>, window_params = [{transform_indices = @transform_0, window_bounds = array<i64: 3>}, {transform_indices = @transform_1, window_bounds = array<i64: 1, 8, 32>}, {pipeline_mode = #tpu.pipeline_mode<synchronous>, transform_indices = @transform_2, window_bounds = array<i64: 32, 96>}, {pipeline_mode = #tpu.pipeline_mode<synchronous>, transform_indices = @transform_3, window_bounds = array<i64: 1, 96>}, {pipeline_mode = #tpu.pipeline_mode<synchronous>, transform_indices = @transform_4, window_bounds = array<i64: 32, 32>}, {pipeline_mode = #tpu.pipeline_mode<synchronous>, transform_indices = @transform_5, window_bounds = array<i64: 1, 32>}, {pipeline_mode = #tpu.pipeline_mode<synchronous>, transform_indices = @transform_6, window_bounds = array<i64: 32, 4>}, {pipeline_mode = #tpu.pipeline_mode<synchronous>, transform_indices = @transform_7, window_bounds = array<i64: 1, 4>}, {pipeline_mode = #tpu.pipeline_mode<synchronous>, transform_indices = @transform_8, window_bounds = array<i64: 4, 32>}, {pipeline_mode = #tpu.pipeline_mode<synchronous>, transform_indices = @transform_9, window_bounds = array<i64: 1, 32>}, {pipeline_mode = #tpu.pipeline_mode<synchronous>, transform_indices = @transform_10, window_bounds = array<i64: 1, 32>}, {transform_indices = @transform_11, window_bounds = array<i64: 1, 8, 32>}]} {
    %c0 = arith.constant 0 : index
    %c0_0 = arith.constant 0 : index
    %c0_1 = arith.constant 0 : index
    %0 = vector.load %arg2[%c0, %c0_0, %c0_1] : memref<1x8x32xf32, #tpu.memory_space<vmem>>, vector<1x8x32xf32>
    %1 = vector.shape_cast %0 : vector<1x8x32xf32> to vector<8x32xf32>
    %c0_2 = arith.constant 0 : index
    %c0_3 = arith.constant 0 : index
    %2 = vector.load %arg3[%c0_2, %c0_3] : memref<32x96xf32, #tpu.memory_space<vmem>>, vector<32x96xf32>
    %cst = arith.constant dense<0.000000e+00> : vector<8x96xf32>
    %3 = tpu.matmul %1, %2, %cst {dimension_numbers = #tpu.dot_dimension_numbers<[1], [0], [0], [1], [0, 0, 1, 1], [], []>} : vector<8x32xf32>, vector<32x96xf32>, vector<8x96xf32> -> vector<8x96xf32>
    %c0_4 = arith.constant 0 : index
    %c0_5 = arith.constant 0 : index
    %4 = vector.load %arg4[%c0_4, %c0_5] : memref<1x96xf32, #tpu.memory_space<vmem>>, vector<1x96xf32>
    %5 = vector.broadcast %4 : vector<1x96xf32> to vector<8x96xf32>
    %6 = arith.addf %3, %5 : vector<8x96xf32>
    %7 = vector.extract_strided_slice %6 {offsets = [0, 0], sizes = [8, 32], strides = [1, 1]} : vector<8x96xf32> to vector<8x32xf32>
    %8 = vector.extract_strided_slice %6 {offsets = [0, 32], sizes = [8, 32], strides = [1, 1]} : vector<8x96xf32> to vector<8x32xf32>
    %9 = vector.extract_strided_slice %6 {offsets = [0, 64], sizes = [8, 32], strides = [1, 1]} : vector<8x96xf32> to vector<8x32xf32>
    %10 = vector.extract_strided_slice %7 {offsets = [0, 0], sizes = [8, 8], strides = [1, 1]} : vector<8x32xf32> to vector<8x8xf32>
    %11 = vector.extract_strided_slice %8 {offsets = [0, 0], sizes = [8, 8], strides = [1, 1]} : vector<8x32xf32> to vector<8x8xf32>
    %12 = vector.extract_strided_slice %9 {offsets = [0, 0], sizes = [8, 8], strides = [1, 1]} : vector<8x32xf32> to vector<8x8xf32>
    %cst_6 = arith.constant dense<0.000000e+00> : vector<8x8xf32>
    %13 = tpu.matmul %10, %11, %cst_6 {dimension_numbers = #tpu.dot_dimension_numbers<[1], [1], [0], [0], [0, 0, 1, 0], [], []>} : vector<8x8xf32>, vector<8x8xf32>, vector<8x8xf32> -> vector<8x8xf32>
    %cst_7 = arith.constant 0.353553385 : f32
    %14 = vector.broadcast %cst_7 : f32 to vector<8x8xf32>
    %15 = arith.mulf %13, %14 : vector<8x8xf32>
    %cst_8 = arith.constant dense<0xFF800000> : vector<8xf32>
    %16 = vector.multi_reduction <maximumf>, %15, %cst_8 [1] : vector<8x8xf32> to vector<8xf32>
    %17 = vector.shape_cast %16 : vector<8xf32> to vector<8x1xf32>
    %18 = vector.broadcast %17 : vector<8x1xf32> to vector<8x8xf32>
    %19 = arith.subf %15, %18 : vector<8x8xf32>
    %20 = math.exp %19 : vector<8x8xf32>
    %cst_9 = arith.constant dense<0.000000e+00> : vector<8xf32>
    %21 = vector.multi_reduction <add>, %20, %cst_9 [1] : vector<8x8xf32> to vector<8xf32>
    %22 = vector.shape_cast %21 : vector<8xf32> to vector<8x1xf32>
    %23 = vector.broadcast %22 : vector<8x1xf32> to vector<8x8xf32>
    %24 = arith.divf %20, %23 : vector<8x8xf32>
    %cst_10 = arith.constant dense<0.000000e+00> : vector<8x8xf32>
    %25 = tpu.matmul %24, %12, %cst_10 {dimension_numbers = #tpu.dot_dimension_numbers<[1], [0], [0], [1], [0, 0, 1, 1], [], []>} : vector<8x8xf32>, vector<8x8xf32>, vector<8x8xf32> -> vector<8x8xf32>
    %26 = vector.extract_strided_slice %7 {offsets = [0, 8], sizes = [8, 8], strides = [1, 1]} : vector<8x32xf32> to vector<8x8xf32>
    %27 = vector.extract_strided_slice %8 {offsets = [0, 8], sizes = [8, 8], strides = [1, 1]} : vector<8x32xf32> to vector<8x8xf32>
    %28 = vector.extract_strided_slice %9 {offsets = [0, 8], sizes = [8, 8], strides = [1, 1]} : vector<8x32xf32> to vector<8x8xf32>
    %cst_11 = arith.constant dense<0.000000e+00> : vector<8x8xf32>
    %29 = tpu.matmul %26, %27, %cst_11 {dimension_numbers = #tpu.dot_dimension_numbers<[1], [1], [0], [0], [0, 0, 1, 0], [], []>} : vector<8x8xf32>, vector<8x8xf32>, vector<8x8xf32> -> vector<8x8xf32>
    %cst_12 = arith.constant 0.353553385 : f32
    %30 = vector.broadcast %cst_12 : f32 to vector<8x8xf32>
    %31 = arith.mulf %29, %30 : vector<8x8xf32>
    %cst_13 = arith.constant dense<0xFF800000> : vector<8xf32>
    %32 = vector.multi_reduction <maximumf>, %31, %cst_13 [1] : vector<8x8xf32> to vector<8xf32>
    %33 = vector.shape_cast %32 : vector<8xf32> to vector<8x1xf32>
    %34 = vector.broadcast %33 : vector<8x1xf32> to vector<8x8xf32>
    %35 = arith.subf %31, %34 : vector<8x8xf32>
    %36 = math.exp %35 : vector<8x8xf32>
    %cst_14 = arith.constant dense<0.000000e+00> : vector<8xf32>
    %37 = vector.multi_reduction <add>, %36, %cst_14 [1] : vector<8x8xf32> to vector<8xf32>
    %38 = vector.shape_cast %37 : vector<8xf32> to vector<8x1xf32>
    %39 = vector.broadcast %38 : vector<8x1xf32> to vector<8x8xf32>
    %40 = arith.divf %36, %39 : vector<8x8xf32>
    %cst_15 = arith.constant dense<0.000000e+00> : vector<8x8xf32>
    %41 = tpu.matmul %40, %28, %cst_15 {dimension_numbers = #tpu.dot_dimension_numbers<[1], [0], [0], [1], [0, 0, 1, 1], [], []>} : vector<8x8xf32>, vector<8x8xf32>, vector<8x8xf32> -> vector<8x8xf32>
    %42 = vector.extract_strided_slice %7 {offsets = [0, 16], sizes = [8, 8], strides = [1, 1]} : vector<8x32xf32> to vector<8x8xf32>
    %43 = vector.extract_strided_slice %8 {offsets = [0, 16], sizes = [8, 8], strides = [1, 1]} : vector<8x32xf32> to vector<8x8xf32>
    %44 = vector.extract_strided_slice %9 {offsets = [0, 16], sizes = [8, 8], strides = [1, 1]} : vector<8x32xf32> to vector<8x8xf32>
    %cst_16 = arith.constant dense<0.000000e+00> : vector<8x8xf32>
    %45 = tpu.matmul %42, %43, %cst_16 {dimension_numbers = #tpu.dot_dimension_numbers<[1], [1], [0], [0], [0, 0, 1, 0], [], []>} : vector<8x8xf32>, vector<8x8xf32>, vector<8x8xf32> -> vector<8x8xf32>
    %cst_17 = arith.constant 0.353553385 : f32
    %46 = vector.broadcast %cst_17 : f32 to vector<8x8xf32>
    %47 = arith.mulf %45, %46 : vector<8x8xf32>
    %cst_18 = arith.constant dense<0xFF800000> : vector<8xf32>
    %48 = vector.multi_reduction <maximumf>, %47, %cst_18 [1] : vector<8x8xf32> to vector<8xf32>
    %49 = vector.shape_cast %48 : vector<8xf32> to vector<8x1xf32>
    %50 = vector.broadcast %49 : vector<8x1xf32> to vector<8x8xf32>
    %51 = arith.subf %47, %50 : vector<8x8xf32>
    %52 = math.exp %51 : vector<8x8xf32>
    %cst_19 = arith.constant dense<0.000000e+00> : vector<8xf32>
    %53 = vector.multi_reduction <add>, %52, %cst_19 [1] : vector<8x8xf32> to vector<8xf32>
    %54 = vector.shape_cast %53 : vector<8xf32> to vector<8x1xf32>
    %55 = vector.broadcast %54 : vector<8x1xf32> to vector<8x8xf32>
    %56 = arith.divf %52, %55 : vector<8x8xf32>
    %cst_20 = arith.constant dense<0.000000e+00> : vector<8x8xf32>
    %57 = tpu.matmul %56, %44, %cst_20 {dimension_numbers = #tpu.dot_dimension_numbers<[1], [0], [0], [1], [0, 0, 1, 1], [], []>} : vector<8x8xf32>, vector<8x8xf32>, vector<8x8xf32> -> vector<8x8xf32>
    %58 = vector.extract_strided_slice %7 {offsets = [0, 24], sizes = [8, 8], strides = [1, 1]} : vector<8x32xf32> to vector<8x8xf32>
    %59 = vector.extract_strided_slice %8 {offsets = [0, 24], sizes = [8, 8], strides = [1, 1]} : vector<8x32xf32> to vector<8x8xf32>
    %60 = vector.extract_strided_slice %9 {offsets = [0, 24], sizes = [8, 8], strides = [1, 1]} : vector<8x32xf32> to vector<8x8xf32>
    %cst_21 = arith.constant dense<0.000000e+00> : vector<8x8xf32>
    %61 = tpu.matmul %58, %59, %cst_21 {dimension_numbers = #tpu.dot_dimension_numbers<[1], [1], [0], [0], [0, 0, 1, 0], [], []>} : vector<8x8xf32>, vector<8x8xf32>, vector<8x8xf32> -> vector<8x8xf32>
    %cst_22 = arith.constant 0.353553385 : f32
    %62 = vector.broadcast %cst_22 : f32 to vector<8x8xf32>
    %63 = arith.mulf %61, %62 : vector<8x8xf32>
    %cst_23 = arith.constant dense<0xFF800000> : vector<8xf32>
    %64 = vector.multi_reduction <maximumf>, %63, %cst_23 [1] : vector<8x8xf32> to vector<8xf32>
    %65 = vector.shape_cast %64 : vector<8xf32> to vector<8x1xf32>
    %66 = vector.broadcast %65 : vector<8x1xf32> to vector<8x8xf32>
    %67 = arith.subf %63, %66 : vector<8x8xf32>
    %68 = math.exp %67 : vector<8x8xf32>
    %cst_24 = arith.constant dense<0.000000e+00> : vector<8xf32>
    %69 = vector.multi_reduction <add>, %68, %cst_24 [1] : vector<8x8xf32> to vector<8xf32>
    %70 = vector.shape_cast %69 : vector<8xf32> to vector<8x1xf32>
    %71 = vector.broadcast %70 : vector<8x1xf32> to vector<8x8xf32>
    %72 = arith.divf %68, %71 : vector<8x8xf32>
    %cst_25 = arith.constant dense<0.000000e+00> : vector<8x8xf32>
    %73 = tpu.matmul %72, %60, %cst_25 {dimension_numbers = #tpu.dot_dimension_numbers<[1], [0], [0], [1], [0, 0, 1, 1], [], []>} : vector<8x8xf32>, vector<8x8xf32>, vector<8x8xf32> -> vector<8x8xf32>
    %74 = tpu.concatenate %25, %41, %57, %73 in 1 : vector<8x8xf32>, vector<8x8xf32>, vector<8x8xf32>, vector<8x8xf32> -> vector<8x32xf32>
    %c0_26 = arith.constant 0 : index
    %c0_27 = arith.constant 0 : index
    %75 = vector.load %arg5[%c0_26, %c0_27] : memref<32x32xf32, #tpu.memory_space<vmem>>, vector<32x32xf32>
    %cst_28 = arith.constant dense<0.000000e+00> : vector<8x32xf32>
    %76 = tpu.matmul %74, %75, %cst_28 {dimension_numbers = #tpu.dot_dimension_numbers<[1], [0], [0], [1], [0, 0, 1, 1], [], []>} : vector<8x32xf32>, vector<32x32xf32>, vector<8x32xf32> -> vector<8x32xf32>
    %c0_29 = arith.constant 0 : index
    %c0_30 = arith.constant 0 : index
    %77 = vector.load %arg6[%c0_29, %c0_30] : memref<1x32xf32, #tpu.memory_space<vmem>>, vector<1x32xf32>
    %78 = vector.broadcast %77 : vector<1x32xf32> to vector<8x32xf32>
    %79 = arith.addf %76, %78 : vector<8x32xf32>
    %cst_31 = arith.constant dense<0.000000e+00> : vector<32xf32>
    %80 = vector.multi_reduction <add>, %1, %cst_31 [0] : vector<8x32xf32> to vector<32xf32>
    %81 = vector.shape_cast %80 : vector<32xf32> to vector<1x32xf32>
    %cst_32 = arith.constant 8.000000e+00 : f32
    %82 = vector.broadcast %cst_32 : f32 to vector<1x32xf32>
    %83 = arith.divf %81, %82 : vector<1x32xf32>
    %cst_33 = arith.constant dense<0xFF800000> : vector<32xf32>
    %84 = vector.multi_reduction <maximumf>, %1, %cst_33 [0] : vector<8x32xf32> to vector<32xf32>
    %85 = vector.shape_cast %84 : vector<32xf32> to vector<1x32xf32>
    %86 = tpu.concatenate %83, %85 in 0 : vector<1x32xf32>, vector<1x32xf32> -> vector<2x32xf32>
    %c0_34 = arith.constant 0 : index
    %c0_35 = arith.constant 0 : index
    %87 = vector.load %arg7[%c0_34, %c0_35] : memref<32x4xf32, #tpu.memory_space<vmem>>, vector<32x4xf32>
    %cst_36 = arith.constant dense<0.000000e+00> : vector<2x4xf32>
    %88 = tpu.matmul %86, %87, %cst_36 {dimension_numbers = #tpu.dot_dimension_numbers<[1], [0], [0], [1], [0, 0, 1, 1], [], []>} : vector<2x32xf32>, vector<32x4xf32>, vector<2x4xf32> -> vector<2x4xf32>
    %c0_37 = arith.constant 0 : index
    %c0_38 = arith.constant 0 : index
    %89 = vector.load %arg8[%c0_37, %c0_38] : memref<1x4xf32, #tpu.memory_space<vmem>>, vector<1x4xf32>
    %90 = vector.broadcast %89 : vector<1x4xf32> to vector<2x4xf32>
    %91 = arith.addf %88, %90 : vector<2x4xf32>
    %cst_39 = arith.constant 0.000000e+00 : f32
    %92 = vector.broadcast %cst_39 : f32 to vector<2x4xf32>
    %93 = arith.maximumf %91, %92 : vector<2x4xf32>
    %c0_40 = arith.constant 0 : index
    %c0_41 = arith.constant 0 : index
    %94 = vector.load %arg9[%c0_40, %c0_41] : memref<4x32xf32, #tpu.memory_space<vmem>>, vector<4x32xf32>
    %cst_42 = arith.constant dense<0.000000e+00> : vector<2x32xf32>
    %95 = tpu.matmul %93, %94, %cst_42 {dimension_numbers = #tpu.dot_dimension_numbers<[1], [0], [0], [1], [0, 0, 1, 1], [], []>} : vector<2x4xf32>, vector<4x32xf32>, vector<2x32xf32> -> vector<2x32xf32>
    %c0_43 = arith.constant 0 : index
    %c0_44 = arith.constant 0 : index
    %96 = vector.load %arg10[%c0_43, %c0_44] : memref<1x32xf32, #tpu.memory_space<vmem>>, vector<1x32xf32>
    %97 = vector.broadcast %96 : vector<1x32xf32> to vector<2x32xf32>
    %98 = arith.addf %95, %97 : vector<2x32xf32>
    %99 = arith.negf %98 : vector<2x32xf32>
    %100 = math.exp %99 : vector<2x32xf32>
    %cst_45 = arith.constant 1.000000e+00 : f32
    %101 = vector.broadcast %cst_45 : f32 to vector<2x32xf32>
    %102 = arith.addf %101, %100 : vector<2x32xf32>
    %103 = arith.divf %101, %102 : vector<2x32xf32>
    %104 = vector.extract_strided_slice %103 {offsets = [0, 0], sizes = [1, 32], strides = [1, 1]} : vector<2x32xf32> to vector<1x32xf32>
    %105 = vector.extract_strided_slice %103 {offsets = [1, 0], sizes = [1, 32], strides = [1, 1]} : vector<2x32xf32> to vector<1x32xf32>
    %106 = arith.addf %104, %105 : vector<1x32xf32>
    %c0_46 = arith.constant 0 : index
    %c0_47 = arith.constant 0 : index
    %107 = vector.load %arg11[%c0_46, %c0_47] : memref<1x32xf32, #tpu.memory_space<vmem>>, vector<1x32xf32>
    %108 = vector.broadcast %107 : vector<1x32xf32> to vector<8x32xf32>
    %109 = arith.mulf %1, %108 : vector<8x32xf32>
    %cst_48 = arith.constant dense<0.000000e+00> : vector<8xf32>
    %110 = vector.multi_reduction <add>, %109, %cst_48 [1] : vector<8x32xf32> to vector<8xf32>
    %111 = vector.shape_cast %110 : vector<8xf32> to vector<8x1xf32>
    %c2 = arith.constant 2 : index
    %112 = memref.load %arg1[%c2] : memref<3xf32, #tpu.memory_space<smem>>
    %113 = vector.broadcast %112 : f32 to vector<8x1xf32>
    %114 = arith.addf %111, %113 : vector<8x1xf32>
    %115 = arith.negf %114 : vector<8x1xf32>
    %116 = math.exp %115 : vector<8x1xf32>
    %cst_49 = arith.constant 1.000000e+00 : f32
    %117 = vector.broadcast %cst_49 : f32 to vector<8x1xf32>
    %118 = arith.addf %117, %116 : vector<8x1xf32>
    %119 = arith.divf %117, %118 : vector<8x1xf32>
    %c0_50 = arith.constant 0 : index
    %120 = memref.load %arg1[%c0_50] : memref<3xf32, #tpu.memory_space<smem>>
    %c1 = arith.constant 1 : index
    %121 = memref.load %arg1[%c1] : memref<3xf32, #tpu.memory_space<smem>>
    %122 = vector.broadcast %120 : f32 to vector<1x32xf32>
    %123 = arith.mulf %122, %106 : vector<1x32xf32>
    %124 = vector.broadcast %123 : vector<1x32xf32> to vector<8x32xf32>
    %125 = arith.mulf %124, %1 : vector<8x32xf32>
    %126 = arith.addf %79, %125 : vector<8x32xf32>
    %127 = vector.broadcast %121 : f32 to vector<8x1xf32>
    %128 = arith.mulf %127, %119 : vector<8x1xf32>
    %129 = vector.broadcast %128 : vector<8x1xf32> to vector<8x32xf32>
    %130 = arith.mulf %129, %1 : vector<8x32xf32>
    %131 = arith.addf %126, %130 : vector<8x32xf32>
    %c0_51 = arith.constant 0 : index
    %c0_52 = arith.constant 0 : index
    %c0_53 = arith.constant 0 : index
    %132 = vector.load %arg12[%c0_51, %c0_52, %c0_53] : memref<1x8x32xf32, #tpu.memory_space<vmem>>, vector<1x8x32xf32>
    %133 = vector.shape_cast %132 : vector<1x8x32xf32> to vector<8x32xf32>
    %134 = vector.shape_cast %131 : vector<8x32xf32> to vector<1x8x32xf32>
    tpu.vector_store %arg12[%c0_51, %c0_52, %c0_53], %134 {strides = array<i32>} : memref<1x8x32xf32, #tpu.memory_space<vmem>>, vector<1x8x32xf32>,
    return
  }
  func.func @transform_0(%arg0: i32) -> i32 {
    %c0_i32 = arith.constant 0 : i32
    %c0_i32_0 = arith.constant 0 : i32
    return %c0_i32 : i32
  }
  func.func @transform_1(%arg0: i32) -> (i32, i32, i32) {
    %c0_i32 = arith.constant 0 : i32
    %c0_i32_0 = arith.constant 0 : i32
    %c0_i32_1 = arith.constant 0 : i32
    return %arg0, %c0_i32, %c0_i32_0 : i32, i32, i32
  }
  func.func @transform_2(%arg0: i32) -> (i32, i32) {
    %c0_i32 = arith.constant 0 : i32
    %c0_i32_0 = arith.constant 0 : i32
    %c0_i32_1 = arith.constant 0 : i32
    return %c0_i32, %c0_i32_0 : i32, i32
  }
  func.func @transform_3(%arg0: i32) -> (i32, i32) {
    %c0_i32 = arith.constant 0 : i32
    %c0_i32_0 = arith.constant 0 : i32
    %c0_i32_1 = arith.constant 0 : i32
    return %c0_i32, %c0_i32_0 : i32, i32
  }
  func.func @transform_4(%arg0: i32) -> (i32, i32) {
    %c0_i32 = arith.constant 0 : i32
    %c0_i32_0 = arith.constant 0 : i32
    %c0_i32_1 = arith.constant 0 : i32
    return %c0_i32, %c0_i32_0 : i32, i32
  }
  func.func @transform_5(%arg0: i32) -> (i32, i32) {
    %c0_i32 = arith.constant 0 : i32
    %c0_i32_0 = arith.constant 0 : i32
    %c0_i32_1 = arith.constant 0 : i32
    return %c0_i32, %c0_i32_0 : i32, i32
  }
  func.func @transform_6(%arg0: i32) -> (i32, i32) {
    %c0_i32 = arith.constant 0 : i32
    %c0_i32_0 = arith.constant 0 : i32
    %c0_i32_1 = arith.constant 0 : i32
    return %c0_i32, %c0_i32_0 : i32, i32
  }
  func.func @transform_7(%arg0: i32) -> (i32, i32) {
    %c0_i32 = arith.constant 0 : i32
    %c0_i32_0 = arith.constant 0 : i32
    %c0_i32_1 = arith.constant 0 : i32
    return %c0_i32, %c0_i32_0 : i32, i32
  }
  func.func @transform_8(%arg0: i32) -> (i32, i32) {
    %c0_i32 = arith.constant 0 : i32
    %c0_i32_0 = arith.constant 0 : i32
    %c0_i32_1 = arith.constant 0 : i32
    return %c0_i32, %c0_i32_0 : i32, i32
  }
  func.func @transform_9(%arg0: i32) -> (i32, i32) {
    %c0_i32 = arith.constant 0 : i32
    %c0_i32_0 = arith.constant 0 : i32
    %c0_i32_1 = arith.constant 0 : i32
    return %c0_i32, %c0_i32_0 : i32, i32
  }
  func.func @transform_10(%arg0: i32) -> (i32, i32) {
    %c0_i32 = arith.constant 0 : i32
    %c0_i32_0 = arith.constant 0 : i32
    %c0_i32_1 = arith.constant 0 : i32
    return %c0_i32, %c0_i32_0 : i32, i32
  }
  func.func @transform_11(%arg0: i32) -> (i32, i32, i32) {
    %c0_i32 = arith.constant 0 : i32
    %c0_i32_0 = arith.constant 0 : i32
    %c0_i32_1 = arith.constant 0 : i32
    return %arg0, %c0_i32, %c0_i32_0 : i32, i32, i32
  }
}

</mosaic_0001>

<bundles_post_ra>
// kernel: tpu_custom_call.1
= control target key start
LH: loop header
LB: loop body
LE: loop exit
PB: predicated region body
PF: predicated region fallthrough
CT: control target
= control target key end

     0   :  { %s1914_s0 = inlined_call_operand.vmem [shape: f32[3], index: 0, kind: input, shape index: {}]   ;;  %s1915_s1 = inlined_call_operand.hbm [shape: f32[2,8,32], index: 1, kind: input, shape index: {}]   ;;  %s1916_s2 = inlined_call_operand.vmem [shape: f32[32,96], index: 2, kind: input, shape index: {}]   ;;  %s1917_s3 = inlined_call_operand.hbm [shape: f32[1,96], index: 3, kind: input, shape index: {}]   ;;  %s1918_s4 = inlined_call_operand.hbm [shape: f32[32,32], index: 4, kind: input, shape index: {}]   ;;  %s1919_s5 = inlined_call_operand.hbm [shape: f32[1,32], index: 5, kind: input, shape index: {}]   ;;  %s1920_s6 = inlined_call_operand.vmem [shape: f32[32,4], index: 6, kind: input, shape index: {}]   ;;  %s1921_s7 = inlined_call_operand.vmem [shape: f32[1,4], index: 7, kind: input, shape index: {}]   ;;  %s1922_s8 = inlined_call_operand.vmem [shape: f32[4,32], index: 8, kind: input, shape index: {}]   ;;  %s1923_s9 = inlined_call_operand.vmem [shape: f32[1,32], index: 9, kind: input, shape index: {}]   ;;  %s1924_s10 = inlined_call_operand.vmem [shape: f32[1,32], index: 10, kind: input, shape index: {}]   ;;  %s1925_s11 = inlined_call_operand.hbm [shape: f32[2,8,32], index: 11, kind: output, shape index: {}]  }
   0x1   :  { %1927 = sst [smem:[#allocation20_spill]] %s1914_s0 }
   0x2   :  { %1928 = sst [smem:[#allocation21_spill]] %s1917_s3 }
   0x3   :  { %1929 = sst [smem:[#allocation22_spill]] %s1918_s4 }
   0x4   :  { %1930 = sst [smem:[#allocation23_spill]] %s1919_s5 }
   0x5   :  { %16 = vsyncpa [#allocation5], 0 }
   0x6   :  { %17 = vsyncpa [#allocation3], 0 }
   0x7   :  { %19 = vsyncpa [#allocation3 + $0x1], 0 }
   0x8   :  { %20 = vsyncpa [#allocation8], 0 }
   0x9   :  { %21 = vsyncpa [#allocation11], 0 }
   0xa   :  { %22 = vsyncpa [#allocation4], 0 }
   0xb   :  { %24 = vsyncpa [#allocation4 + $0x1], 0  ;;  %s1614_s17 = smov 0   ;;  %s1616_s18 = smov 0  }
   0xc   :  { %s1618_s19 = smov 0   ;;  %s1620_s20 = smov 0  }
   0xd LB: > { %1931 = sst [smem:[#allocation18_spill]] %s1527_s19  ;;  %s1638_s24 = sadd.s32 4294967295, %s1531_s20   ;;  %s1531_s20 = sphi %s1620_s20, %s1951_s20   ;;  %s1527_s19 = sphi %s1618_s19, %s1948_s19   ;;  %s1523_s18 = sphi %s1616_s18, %s1950_s18   ;;  %s1519_s17 = sphi %s1614_s17, %s1949_s17  }
   0xe   : > { %s1932_s3 = sld [smem:[#allocation21_spill]]  ;;  %p1143_p0 = scmp.ge.s32.totalorder %s1531_s20, 1 }
   0xf   : > { %p72_p1 = scmp.eq.s32.totalorder %s1638_s24, 0  ;;  %p297_p2 = scmp.lt.s32.totalorder %s1531_s20, 3 }
  0x10   : > { %s1533_s26 = smov [#allocation7]   ;;  %s1934_s0 = sld [smem:[#allocation20_spill]] }
  0x11   : > { %p1643_p3 = pnand %p1143_p0, %p297_p2  ;;  %s324_s27 = sshll.u32 %s1533_s26, 4  ;;  %s325_s27 = int_to_ptr.vmem [resolvable:$true] %s324_s27 }
  0x12   : > { %s1936_s4 = sld [smem:[#allocation22_spill]]  ;;  %s1534_s16 = smov [#allocation9]  }
  0x13   : > { %p1203_p5 = pneg %p1643_p3  ;;  %s335_s21 = sshll.u32 %s1534_s16, 4  ;;  %s336_s21 = int_to_ptr.vmem [resolvable:$true] %s335_s21 }
  0x14   : > { %s322_s23 = sshll.u32 %s1932_s3, 4  ;;  %s1535_s22 = smov [#allocation2]   ;;  %s323_s23 = int_to_ptr.hbm [resolvable:$true] %s322_s23 }
  0x15   : > { %p1655_p6 = pnand %p1203_p5, %p72_p1  ;;  %s1937_s5 = sld [smem:[#allocation23_spill]] }
  0x16   : > { %s309_s30 = sshll.u32 %s1934_s0, 4  ;;  %s1536_s13 = smov 128   ;;  %s310_s30 = int_to_ptr.vmem [resolvable:$true] %s309_s30 }
  0x17   : > { %1209 = dma.hbm_to_vmem [thread:$0]  (!%p1655_p6), %s323_s23, 16, %s325_s27, [#allocation8]  }
  0x18   : > { %s333_s15 = sshll.u32 %s1936_s4, 4  ;;  %s1537_s14 = smov 8   ;;  %s334_s15 = int_to_ptr.hbm [resolvable:$true] %s333_s15 }
  0x19   : > { %1206 = dma.vmem_to_smem (!%p1655_p6), %s310_s30, 16, %s1535_s22, [#allocation5]  }
  0x1a   : > { %1212 = dma.hbm_to_vmem [thread:$0]  (!%p1655_p6), %s334_s15, 512, %s336_s21, [#allocation8], %s1536_s13, %s1536_s13, %s1537_s14  }
  0x1b   : > { %s348_s29 = sshll.u32 %s1937_s5, 4  ;;  %s1538_s23 = smov [#allocation10]   ;;  %s349_s29 = int_to_ptr.hbm [resolvable:$true] %s348_s29 }
  0x1c   : > { %s350_s27 = sshll.u32 %s1538_s23, 4  ;;  %s1142_s30 = sadd.s32 4294967294, %s1531_s20   ;;  %s351_s27 = int_to_ptr.vmem [resolvable:$true] %s350_s27 }
  0x1d   : > { %1215 = dma.hbm_to_vmem [thread:$0]  (!%p1655_p6), %s349_s29, 16, %s351_s27, [#allocation11]  }
  0x1e   : > { %s1675_s16 = sadd.s32 1, %s1531_s20   ;;  %s58_s26 = sadd.s32 1, %s1527_s19 }
  0x1f   : > { %s55_s22 = ssub.s32 %s1531_s20, %s1675_s16  ;;  %p65_p8 = scmp.ne.s32.totalorder %s1527_s19, %s1523_s18 }
  0x20   : > { %p56_p7 = scmp.eq.s32.totalorder %s55_s22, 0  ;;  %p66_p9 = scmp.eq.s32.totalorder %s1531_s20, 0 }
  0x21   : > { %p71_p10 = scmp.ne.s32.totalorder %s1523_s18, %s1519_s17  ;;  %p284_p13 = scmp.eq.s32.totalorder %s1638_s24, 1 }
  0x22   : > { %s1686_s15 = scalar_select %p56_p7, %s1527_s19, %s58_s26  }
  0x23   : > { %p1688_p11 = por %p66_p9, %p65_p8  ;;  %p1694_p12 = por %p72_p1, %p71_p10 }
  0x24   : > { %1938 = sst [smem:[#allocation19_spill]] %s1686_s15  ;;  %p290_p0 = scmp.eq.s32.totalorder %s1142_s30, 1 }
  0x25   : > { %p1228_p2 = scmp.lt.s32.totalorder %s1531_s20, 2  ;;  %s376_s28 = sand.u32 1, %s1527_s19  }
  0x26   : > { %p1701_p5 = por %p284_p13, %p65_p8  ;;  %p1705_p6 = por %p290_p0, %p71_p10 }
  0x27   : > { %s1149_s14 = sshll.u32 %s376_s28, 3  ;;  %s1150_s23 = sshll.u32 %s1531_s20, 3 }
  0x28   : > { %s384_s26 = scalar_lea.hbm %s1915_s1, %s1150_s23  ;;  %s380_s0 = scalar_lea.vmem [#allocation6], %s1149_s14 }
  0x29   : > { %s388_s3 = sshll.u32 %s380_s0, 4  ;;  %s386_s4 = sshll.u32 %s384_s26, 4  ;;  %s389_s3 = int_to_ptr.vmem [resolvable:$true] %s388_s3  ;;  %s387_s4 = int_to_ptr.hbm [resolvable:$true] %s386_s4 }
  0x2a   : > { %p1715_p7 = pnand %p1228_p2, %p1688_p11  ;;  %s377_s5 = scalar_lea.sflag [#allocation3], %s376_s28 }
  0x2b   : > { %s1423_s15 = sshra.s32 %s387_s4, 4  ;;  %s1430_s23 = scalar_lea.hbm %s1915_s1, 16  ;;  %s1424_s15 = int_to_ptr.hbm [resolvable:$true] %s1423_s15 }
  0x2c   : > { %s1425_s19 = scalar_lea.hbm %s1424_s15, 8  ;;  %p1427_p9 = pneg %p1715_p7 }
  0x2d   : > { %p1426_p8 = scmp.ne.s32.totalorder %s1424_s15, %s1425_s19  ;;  %p1431_p11 = scmp.lt.s32.totalorder %s1424_s15, %s1915_s1 }
  0x2e   : > { %p1432_p0 = scmp.lt.s32.totalorder %s1430_s23, %s1425_s19 }
  0x2f   : > { %p1428_p10 = pnand %p1427_p9, %p1426_p8 }
  0x30   : > { %p1433_p2 = por %p1432_p0, %p1431_p11 }
  0x31   : > { %p1429_p13 = pneg %p1428_p10 }
  0x33   : > { %p1434_p4 = pnand %p1433_p2, %p1429_p13 }
  0x35   : > { %1437 = shalt.err (!%p1434_p4)
}
  0x36   : > { %1219 = dma.hbm_to_vmem [thread:$0]  (!%p1715_p7), %s387_s4, 128, %s389_s3, %s377_s5  }
  0x37   : > { %397 = sbr.rel (%p1643_p3) target bundleno = 1131 (0x46b), region = 64 }
  0x3c   : > { %1498 = dma.done.wait (%p72_p1), [#allocation5], 16  }
  0x3d   : > { %1500 = vsyncadd (%p72_p1), [#allocation5], 4294967280  ;;  %s1736_s28 = sand.u32 1, %s1523_s18  }
  0x3e   : > { %s1153_s19 = sshll.u32 %s1736_s28, 3  ;;  %s405_s15 = scalar_lea.sflag [#allocation3], %s1736_s28 }
  0x3f   : > { %s408_s3 = scalar_lea.vmem [#allocation6], %s1153_s19 }
  0x40   : > { %1502 = dma.done.wait (%p1694_p12), %s405_s15, 128  }
  0x41   : > { %1504 = vsyncadd (%p1694_p12), %s405_s15, 4294967168 }
  0x42   : > { %1506 = dma.done.wait (%p72_p1), [#allocation8], 528  }
  0x43   : > { %1508 = vsyncadd (%p72_p1), [#allocation8], 4294966768 }
  0x44   : > { %1510 = dma.done.wait (%p72_p1), [#allocation11], 16  }
  0x45   : > { %1512 = vsyncadd (%p72_p1), [#allocation11], 4294967280 }
  0x46   : > { %429 = sfence }
  0x47   : > { %v468_v0 = vld [vmem:[%s1916_s2 + $0x18] sm:$0xff]  ;;  %v467_v1 = vld [vmem:[%s1916_s2 + $0x10] sm:$0xff]  ;;  %v466_v2 = vld [vmem:[%s1916_s2 + $0x8] sm:$0xff]  ;;  %vm473_vm0 = vcmask 261120   ;;  %s1539_s0 = smov 112   ;;  %s1540_s23 = smov 120  }
  0x48   : > { %489 = vmatpush.msra.mxu0 %v468_v0  ;;  %v465_v3 = vld [vmem:[%s1916_s2] sm:$0xff]  ;;  %v1287_v5 = vld [vmem:[#allocation7] ss:$0 sm:$0xff]  ;;  %s1541_s27 = smov 96   ;;  %s1542_s21 = smov 72   ;;  %vm500_vm1 = vcmask 64512  }
  0x49   : > { %v1766_v4 = vld [vmem:[%s408_s3] sm:$0xff]  ;;  %s1543_s15 = smov 80   ;;  %s1544_s3 = smov 88   ;;  %vm883_vm15 = vcmask 1040384  }
  0x4a   : > { %490 = vmatpush.msra.mxu0 %v467_v1  ;;  %s1545_s4 = smov 104   ;;  %s1546_s5 = smov 64  }
  0x4b   : > { %s1547_s25 = smov 48   ;;  %s1548_s12 = smov 56  }
  0x4c   : > { %491 = vmatpush.msra.mxu0 %v466_v2  ;;  %s1549_s22 = smov 40   ;;  %v861_v2 = vsel %vm473_vm0, %v1766_v4, 0.0  ;;  %s1553_s26 = smov 24  }
  0x4e   : > { %492 = vmatpush.msra.mxu0 %v465_v3  ;;  %v876_v3 = vsel %vm473_vm0, %v1766_v4, -inf }
  0x4f   : > { %1158 = vmatmul.msk.f32.vlgmr.msra.gmra.mxu0 %vm473_vm0, %v1766_v4 }
  0xcc   : > { %v494_v6 = vpop.f32.mrf.mxu0 }
  0xcd   : > { %v1770_v7 = vadd.f32 %v1287_v5, %v494_v6  ;;  %v862_v6 = vrot.slane %v861_v2, 4 }
  0xcf   : > { %655 = vrot.lane.b32.xlu2 %v1770_v7, %s1539_s0  ;;  %576 = vrot.lane.b32.xlu1 %v1770_v7, %s1540_s23  ;;  %s1473_s23 = scalar_lea.hbm %s1925_s11, 16 }
  0xd0   : > { %498 = vrot.lane.b32.xlu0 %v1770_v7, %s1541_s27  ;;  %s1176_s27 = sld [smem:[#allocation2 + $0x2]] }
  0xd7   : > { %736 = vrot.lane.b32.xlu2 %v1770_v7, %s1542_s21  ;;  %657 = vrot.lane.b32.xlu1 %v1770_v7, %s1543_s15  ;;  %s1003_s21 = sld [smem:[#allocation2]] }
  0xd8   : > { %578 = vrot.lane.b32.xlu0 %v1770_v7, %s1544_s3  ;;  %s1178_s15 = sld [smem:[#allocation2 + $0x1]]  ;;  %s1180_s3 = sshll.u32 %s1638_s24, 3 }
  0xd9   : > { %s1016_s24 = scalar_lea.sflag [#allocation4], %s1736_s28 }
  0xe0   : > { %734 = vrot.lane.b32.xlu0 %v1770_v7, %s1545_s4 }
 0x129   : > { %v656_v8 = vpop.permute.xlu2 %655 }
 0x131   : > { %v737_v9 = vpop.permute.xlu2 %736 }
 0x132   : > { %1168 = vmatpush.xpose.msk.msrb.mxu0 %vm500_vm1, %v737_v9  ;;  %v877_v9 = vrot.slane %v876_v3, 4 }
 0x141   : > { %v577_v10 = vpop.permute.xlu1 %576 }
 0x142   : > { %v499_v11 = vpop.permute.xlu0 %498 }
 0x143   : > { %1159 = vmatpush.xpose.msk.msra.mxu1 %vm500_vm1, %v499_v11  ;;  %v863_v11 = vadd.f32 %v862_v6, %v861_v2 }
 0x146   : > { %1160 = vmatmul.msk.f32.vlgmr.msra.gmra.mxu1 %vm500_vm1, %v1770_v7 }
 0x149   : > { %v658_v12 = vpop.permute.xlu1 %657 }
 0x14a   : > { %v579_v13 = vpop.permute.xlu0 %578  ;;  %1165 = vmatpush.xpose.msk.msrb.mxu1 %vm500_vm1, %v658_v12 }
 0x14b   : > { %1162 = vmatpush.xpose.msk.msra.mxu3 %vm500_vm1, %v579_v13 }
 0x14e   : > { %1163 = vmatmul.msk.f32.vlgmr.msra.gmra.mxu3 %vm500_vm1, %v577_v10  ;;  %1166 = vmatmul.msk.f32.vlgmr.msrb.gmra.mxu1 %vm500_vm1, %v656_v8  ;;  %v1550_v8 = vmov 8.0  }
 0x152   : > { %v735_v14 = vpop.permute.xlu0 %734 }
 0x153   : > { %1169 = vmatmul.msk.f32.vlgmr.msrb.gmra.mxu0 %vm500_vm1, %v735_v14  ;;  %v878_v14 = vmax.f32 %v876_v3, %v877_v9 }
 0x1c3   : > { %v522_v15 = vpop.f32.mrf.mxu1 }
 0x1c4   : > { %v525_v16 = vmul.f32 0.35355338, %v522_v15 }
 0x1c6   : > { %v526_v17 = vsel %vm500_vm1, %v525_v16, -inf }
 0x1c7   : > { %527 = vmax.xlane.f32.xlu1 %v526_v17 }
 0x1cb   : > { %v680_v18 = vpop.f32.mrf.mxu1 }
 0x1cc   : > { %v683_v19 = vmul.f32 0.35355338, %v680_v18  ;;  %v864_v18 = vrot.slane %v863_v11, 2 }
 0x1ce   : > { %v684_v20 = vsel %vm500_vm1, %v683_v19, -inf }
 0x1cf   : > { %685 = vmax.xlane.f32.xlu2 %v684_v20 }
 0x1d0   : > { %v759_v21 = vpop.f32.mrf.mxu0 }
 0x1d1   : > { %v601_v22 = vpop.f32.mrf.mxu3  ;;  %v762_v23 = vmul.f32 0.35355338, %v759_v21 }
 0x1d2   : > { %v604_v24 = vmul.f32 0.35355338, %v601_v22 }
 0x1d3   : > { %v763_v26 = vsel %vm500_vm1, %v762_v23, -inf }
 0x1d4   : > { %v605_v25 = vsel %vm500_vm1, %v604_v24, -inf }
 0x1d5   : > { %606 = vmax.xlane.f32.xlu0 %v605_v25 }
 0x1d7   : > { %764 = vmax.xlane.f32.xlu2 %v763_v26 }
 0x23a   : > { %v528_v27 = vpop.xlane.xlu1 %527 }
 0x23b   : > { %v529_v28 = vsub.f32 %v525_v16, %v528_v27 }
 0x23d   : > { %v530_v29 = vmul.f32 1.442695, %v529_v28 }
 0x23f   : > { %1292 = vpow2.f32 %v530_v29 }
 0x242   : > { %v686_v30 = vpop.xlane.xlu2 %685 }
 0x243   : > { %v687_v31 = vsub.f32 %v683_v19, %v686_v30  ;;  %v879_v19 = vrot.slane %v878_v14, 2 }
 0x245   : > { %v1293_v32 = vpop.eup %1292  ;;  %v688_v33 = vmul.f32 1.442695, %v687_v31  ;;  %v880_v27 = vmax.f32 %v878_v14, %v879_v19  ;;  %v832_v14 = vld [vmem:[#allocation9 + $0x10] sm:$0xff] }
 0x246   : > { %v532_v34 = vsel %vm500_vm1, %v1293_v32, 0.0 }
 0x247   : > { %1294 = vpow2.f32 %v688_v33  ;;  %533 = vadd.xlane.f32.xlu1 %v532_v34 }
 0x248   : > { %v607_v35 = vpop.xlane.xlu0 %606 }
 0x249   : > { %v608_v36 = vsub.f32 %v604_v24, %v607_v35  ;;  %v865_v24 = vadd.f32 %v864_v18, %v863_v11 }
 0x24a   : > { %v765_v37 = vpop.xlane.xlu2 %764 }
 0x24b   : > { %v609_v38 = vmul.f32 1.442695, %v608_v36  ;;  %v766_v39 = vsub.f32 %v762_v23, %v765_v37  ;;  %v866_v28 = vrot.slane %v865_v24, 1  ;;  %v881_v36 = vrot.slane %v880_v27, 1 }
 0x24d   : > { %v1793_v40 = vpop.eup %1294  ;;  %1296 = vpow2.f32 %v609_v38  ;;  %v767_v41 = vmul.f32 1.442695, %v766_v39 }
 0x24e   : > { %v690_v42 = vsel %vm500_vm1, %v1793_v40, 0.0 }
 0x24f   : > { %1298 = vpow2.f32 %v767_v41  ;;  %691 = vadd.xlane.f32.xlu2 %v690_v42  ;;  %v888_v41 = vld [vmem:[%s1920_s6 + $0x18] sm:$0xff]  ;;  %v867_v42 = vadd.f32 %v866_v28, %v865_v24 }
 0x253   : > { %v1797_v43 = vpop.eup %1296 }
 0x254   : > { %v611_v44 = vsel %vm500_vm1, %v1797_v43, 0.0 }
 0x255   : > { %v1801_v45 = vpop.eup %1298  ;;  %612 = vadd.xlane.f32.xlu0 %v611_v44 }
 0x256   : > { %v769_v46 = vsel %vm500_vm1, %v1801_v45, 0.0 }
 0x257   : > { %770 = vadd.xlane.f32.xlu1 %v769_v46 }
 0x267   : > { %550 = vrot.lane.b32.xlu2 %v1770_v7, %s1546_s5  ;;  %s1551_s5 = smov 16  }
 0x269   : > { %708 = vrot.lane.b32.xlu0 %v1770_v7, %s1547_s25  ;;  %s1026_s25 = scalar_lea.hbm %s1925_s11, %s1180_s3 }
 0x270   : > { %629 = vrot.lane.b32.xlu1 %v1770_v7, %s1548_s12  ;;  %s463_s12 = scalar_lea.vmem [#allocation12], %s1153_s19 }
 0x271   : > { %787 = vrot.lane.b32.xlu0 %v1770_v7, %s1549_s22  ;;  %s1552_s22 = smov 8  }
 0x2ba   : > { %v534_v47 = vpop.xlane.xlu1 %533 }
 0x2bb   : > { %1300 = vrcp.f32 %v534_v47  ;;  %v546_v53 = vand.u32 2147483648, %v534_v47  ;;  %v544_v54 = vand.u32 2147483647, %v534_v47  ;;  %vm540_vm3 = vweird.f32 %v534_v47 }
 0x2bd   : > { %v547_v58 = vor.u32 1.1754944e-38, %v546_v53  ;;  %vm545_vm5 = vcmp.eq.f32.partialorder %v544_v54, 8.507059e+37 }
 0x2c1   : > { %v1301_v48 = vpop.eup %1300 }
 0x2c2   : > { %v536_v49 = vmul.f32 %v1301_v48, %v534_v47  ;;  %v692_v50 = vpop.xlane.xlu2 %691  ;;  %vm541_vm2 = vweird.f32 %v1301_v48 }
 0x2c3   : > { %1302 = vrcp.f32 %v692_v50  ;;  %vm542_vm4 = vmor %vm540_vm3, %vm541_vm2  ;;  %v704_v15 = vand.u32 2147483648, %v692_v50  ;;  %vm698_vm7 = vweird.f32 %v692_v50  ;;  %v702_v17 = vand.u32 2147483647, %v692_v50 }
 0x2c4   : > { %v537_v51 = vsub.f32 1.0, %v536_v49 }
 0x2c5   : > { %v705_v25 = vor.u32 1.1754944e-38, %v704_v15  ;;  %vm703_vm9 = vcmp.eq.f32.partialorder %v702_v17, 8.507059e+37  ;;  %v831_v15 = vld [vmem:[#allocation9 + $0x8] sm:$0xff] }
 0x2c6   : > { %v538_v52 = vmul.f32 %v1301_v48, %v537_v51 }
 0x2c8   : > { %v1809_v55 = vpop.xlane.xlu0 %612  ;;  %v539_v56 = vadd.f32 %v1301_v48, %v538_v52  ;;  %v886_v52 = vld [vmem:[%s1920_s6 + $0x8] sm:$0xff] }
 0x2c9   : > { %v1303_v57 = vpop.eup %1302  ;;  %1304 = vrcp.f32 %v1809_v55  ;;  %v625_v33 = vand.u32 2147483648, %v1809_v55  ;;  %vm619_vm11 = vweird.f32 %v1809_v55  ;;  %v623_v34 = vand.u32 2147483647, %v1809_v55 }
 0x2ca   : > { %v694_v59 = vmul.f32 %v1303_v57, %v692_v50  ;;  %v1812_v60 = vpop.xlane.xlu1 %770  ;;  %v551_v61 = vpop.permute.xlu2 %550  ;;  %v543_v62 = vsel %vm542_vm4, %v1301_v48, %v539_v56  ;;  %vm699_vm6 = vweird.f32 %v1303_v57  ;;  %v882_v50 = vmax.f32 %v880_v27, %v881_v36  ;;  %v885_v56 = vld [vmem:[%s1920_s6] sm:$0xff] }
 0x2cb   : > { %1306 = vrcp.f32 %v1812_v60  ;;  %571 = vmatpush.msra.mxu2 %v551_v61  ;;  %v548_v0 = vsel %vm545_vm5, %v547_v58, %v543_v62  ;;  %vm700_vm8 = vmor %vm698_vm7, %vm699_vm6  ;;  %v626_v48 = vor.u32 1.1754944e-38, %v625_v33  ;;  %vm624_vm14 = vcmp.eq.f32.partialorder %v623_v34, 8.507059e+37 }
 0x2cc   : > { %v695_v63 = vsub.f32 1.0, %v694_v59  ;;  %v549_v1 = vmul.f32 %v1293_v32, %v548_v0  ;;  %1308 = vrcp.f32 %v1550_v8  ;;  %vm777_vm3 = vweird.f32 %v1812_v60 }
 0x2cd   : > { %vm926_vm6 = vcmask 1043456   ;;  %vm922_vm7 = vcmask 31744   ;;  %v982_v27 = vstv %s1176_s27 }
 0x2ce   : > { %v696_v5 = vmul.f32 %v1303_v57, %v695_v63  ;;  %1161 = vmatmul.msk.f32.vlgmr.msra.gmra.mxu2 %vm500_vm1, %v549_v1 }
 0x2cf   : > { %v1305_v7 = vpop.eup %1304 }
 0x2d0   : > { %v615_v10 = vmul.f32 %v1305_v7, %v1809_v55  ;;  %v697_v13 = vadd.f32 %v1303_v57, %v696_v5  ;;  %vm620_vm10 = vweird.f32 %v1305_v7  ;;  %v783_v55 = vand.u32 2147483648, %v1812_v60  ;;  %v1288_v5 = vld [vmem:[%s1921_s7] ss:$0 sm:$0xff] }
 0x2d1   : > { %v1821_v12 = vpop.eup %1306  ;;  %vm1828_vm12 = vmor %vm619_vm11, %vm620_vm10 }
 0x2d2   : > { %v616_v16 = vsub.f32 1.0, %v615_v10  ;;  %v773_v21 = vmul.f32 %v1821_v12, %v1812_v60  ;;  %v1309_v22 = vpop.eup %1308  ;;  %v701_v23 = vsel %vm700_vm8, %v1303_v57, %v697_v13  ;;  %vm778_vm2 = vweird.f32 %v1821_v12  ;;  %v1289_v10 = vld [vmem:[%s1924_s10] ss:$0 sm:$0xff]  ;;  %v833_v13 = vld [vmem:[#allocation9 + $0x18] sm:$0xff] }
 0x2d3   : > { %v869_v26 = vmul.f32 8.0, %v1309_v22  ;;  %v706_v31 = vsel %vm703_vm9, %v705_v25, %v701_v23  ;;  %vm873_vm13 = vweird.f32 %v1309_v22  ;;  %v781_v57 = vand.u32 2147483647, %v1812_v60  ;;  %vm779_vm4 = vmor %vm777_vm3, %vm778_vm2  ;;  %853 = vmatpush.msra.mxu1 %v833_v13  ;;  %v1290_v23 = vld [vmem:[%s1923_s9] ss:$0 sm:$0xff] }
 0x2d4   : > { %v617_v20 = vmul.f32 %v1305_v7, %v616_v16  ;;  %v774_v30 = vsub.f32 1.0, %v773_v21  ;;  %v707_v39 = vmul.f32 %v1793_v40, %v706_v31  ;;  %v887_v40 = vld [vmem:[%s1920_s6 + $0x10] sm:$0xff]  ;;  %v784_v0 = vor.u32 1.1754944e-38, %v783_v55 }
 0x2d5   : > { %v870_v32 = vsub.f32 1.0, %v869_v26  ;;  %vm782_vm5 = vcmp.eq.f32.partialorder %v781_v57, 8.507059e+37  ;;  %v977_v11 = vmul.f32 %v1289_v10, %v1766_v4  ;;  %854 = vmatpush.msra.mxu1 %v832_v14  ;;  %v830_v16 = vld [vmem:[#allocation9] sm:$0xff]  ;;  %vm826_vm8 = vcmask 130048  }
 0x2d6   : > { %v618_v29 = vadd.f32 %v1305_v7, %v617_v20  ;;  %v775_v44 = vmul.f32 %v1821_v12, %v774_v30  ;;  %vm828_vm9 = vcmask 195584  }
 0x2d7   : > { %v871_v35 = vmul.f32 %v1309_v22, %v870_v32  ;;  %855 = vmatpush.msra.mxu1 %v831_v15 }
 0x2d8   : > { %v622_v46 = vsel %vm1828_vm12, %v1305_v7, %v618_v29  ;;  %v776_v54 = vadd.f32 %v1821_v12, %v775_v44 }
 0x2d9   : > { %v872_v47 = vadd.f32 %v1309_v22, %v871_v35  ;;  %v627_v51 = vsel %vm624_vm14, %v626_v48, %v622_v46  ;;  %856 = vmatpush.msra.mxu1 %v830_v16 }
 0x2da   : > { %v628_v59 = vmul.f32 %v1797_v43, %v627_v51  ;;  %v780_v63 = vsel %vm779_vm4, %v1821_v12, %v776_v54  ;;  %v917_v43 = vld [vmem:[%s1922_s8] sm:$0xf]  ;;  %v978_v12 = vsel %vm473_vm0, %v977_v11, 0.0 }
 0x2db   : > { %v709_v38 = vpop.permute.xlu0 %708  ;;  %v874_v49 = vsel %vm873_vm13, %v1309_v22, %v872_v47  ;;  %v785_v1 = vsel %vm782_vm5, %v784_v0, %v780_v63  ;;  %1173 = vmatpush.msk.msra.mxu0 %vm926_vm6, %v917_v43  ;;  %v1291_v63 = vld [vmem:[#allocation10] ss:$0 sm:$0xff] }
 0x2dc   : > { %729 = vmatpush.msrb.mxu3 %v709_v38  ;;  %v875_v53 = vmul.f32 %v874_v49, %v867_v42  ;;  %v786_v60 = vmul.f32 %v1801_v45, %v785_v1 }
 0x2dd   : > { %1167 = vmatmul.msk.f32.vlgmr.msrb.gmra.mxu3 %vm500_vm1, %v707_v39 }
 0x2de   : > { %908 = vmatpush.msra.mxu3 %v888_v41  ;;  %v884_v61 = vsel %vm883_vm15, %v875_v53, %v882_v50 }
 0x2e0   : > { %909 = vmatpush.msra.mxu3 %v887_v40 }
 0x2e2   : > { %v630_v58 = vpop.permute.xlu1 %629  ;;  %910 = vmatpush.msra.mxu3 %v886_v52 }
 0x2e3   : > { %650 = vmatpush.msrb.mxu2 %v630_v58  ;;  %v788_v62 = vpop.permute.xlu0 %787 }
 0x2e4   : > { %1164 = vmatmul.msk.f32.vlgmr.msrb.gmra.mxu2 %vm500_vm1, %v628_v59  ;;  %911 = vmatpush.msra.mxu3 %v885_v56  ;;  %v1005_v56 = vstv %s1003_s21 }
 0x2e5   : > { %808 = vmatpush.msra.mxu2 %v788_v62  ;;  %1172 = vmatmul.msk.f32.vlgmr.msra.gmra.mxu3 %vm473_vm0, %v884_v61  ;;  %v1010_v62 = vstv %s1178_s15 }
 0x2ec   : > { %1170 = vmatmul.msk.f32.vlgmr.msra.gmra.mxu2 %vm500_vm1, %v786_v60 }
 0x351   : > { %v573_v2 = vpop.f32.mrf.mxu2 }
 0x360   : > { %v731_v3 = vpop.f32.mrf.mxu3 }
 0x361   : > { %818 = vrot.lane.b32.xlu1 %v731_v3, %s1551_s5 }
 0x367   : > { %v652_v6 = vpop.f32.mrf.mxu2 }
 0x368   : > { %814 = vrot.lane.b32.xlu2 %v652_v6, %s1552_s22  ;;  %v913_v45 = vpop.f32.mrf.mxu3  ;;  %s1028_s22 = sshll.u32 %s463_s12, 4  ;;  %s1029_s22 = int_to_ptr.vmem [resolvable:$true] %s1028_s22 }
 0x369   : > { %v914_v7 = vadd.f32 %v1288_v5, %v913_v45 }
 0x36b   : > { %v916_v8 = vmax.f32 %v914_v7, 0.0 }
 0x36d   : > { %1174 = vmatmul.msk.f32.vlgmr.msra.gmra.mxu0 %vm922_vm7, %v916_v8 }
 0x36f   : > { %v810_v9 = vpop.f32.mrf.mxu2 }
 0x370   : > { %822 = vrot.lane.b32.xlu0 %v810_v9, %s1553_s26  ;;  %s1030_s26 = sshll.u32 %s1026_s25, 4  ;;  %s1031_s26 = int_to_ptr.hbm [resolvable:$true] %s1030_s26 }
 0x371   : > { %s1467_s30 = sshra.s32 %s1031_s26, 4  ;;  %s1468_s30 = int_to_ptr.hbm [resolvable:$true] %s1467_s30 }
 0x372   : > { %s1469_s14 = scalar_lea.hbm %s1468_s30, 8  ;;  %p1474_p12 = scmp.lt.s32.totalorder %s1468_s30, %s1925_s11 }
 0x373   : > { %p1470_p1 = scmp.ne.s32.totalorder %s1468_s30, %s1469_s14  ;;  %p1475_p7 = scmp.lt.s32.totalorder %s1473_s23, %s1469_s14 }
 0x375   : > { %p1471_p3 = pnand %p1470_p1, %p1701_p5  ;;  %p1476_p8 = por %p1475_p7, %p1474_p12 }
 0x377   : > { %p1472_p4 = pneg %p1471_p3 }
 0x379   : > { %p1477_p9 = pnand %p1476_p8, %p1472_p4 }
 0x391   : > { %979 = vadd.xlane.f32.xlu2 %v978_v12 }
 0x3c2   : > { %v815_v17 = vpop.permute.xlu2 %814 }
 0x3c3   : > { %v825_v19 = vsel %vm500_vm1, %v573_v2, %v815_v17 }
 0x3d3   : > { %v819_v18 = vpop.permute.xlu1 %818 }
 0x3d4   : > { %v827_v20 = vsel %vm826_vm8, %v825_v19, %v819_v18 }
 0x3e2   : > { %v823_v21 = vpop.permute.xlu0 %822 }
 0x3e3   : > { %v829_v22 = vsel %vm828_vm9, %v827_v20, %v823_v21 }
 0x3e4   : > { %1171 = vmatmul.msk.f32.vlgmr.msra.gmra.mxu1 %vm473_vm0, %v829_v22 }
 0x3ea   : > { %v947_v24 = vpop.f32.mrf.mxu0 }
 0x3eb   : > { %v948_v25 = vadd.f32 %v1290_v23, %v947_v24 }
 0x3ed   : > { %v1175_v26 = vmul.f32 -1.442695, %v948_v25 }
 0x3ef   : > { %1310 = vpow2.f32 %v1175_v26 }
 0x3f5   : > { %v1311_v29 = vpop.eup %1310 }
 0x3f6   : > { %v953_v31 = vadd.f32 1.0, %v1311_v29 }
 0x3f8   : > { %1312 = vrcp.f32 %v953_v31  ;;  %vm959_vm1 = vweird.f32 %v953_v31  ;;  %v965_v41 = vand.u32 2147483648, %v953_v31  ;;  %v963_v44 = vand.u32 2147483647, %v953_v31 }
 0x3fa   : > { %v966_v47 = vor.u32 1.1754944e-38, %v965_v41  ;;  %vm964_vm12 = vcmp.eq.f32.partialorder %v963_v44, 8.507059e+37 }
 0x3fe   : > { %v1313_v33 = vpop.eup %1312 }
 0x3ff   : > { %v955_v35 = vmul.f32 %v1313_v33, %v953_v31  ;;  %vm960_vm10 = vweird.f32 %v1313_v33 }
 0x400   : > { %vm961_vm11 = vmor %vm959_vm1, %vm960_vm10 }
 0x401   : > { %v956_v37 = vsub.f32 1.0, %v955_v35 }
 0x403   : > { %v957_v38 = vmul.f32 %v1313_v33, %v956_v37 }
 0x404   : > { %v980_v28 = vpop.xlane.xlu2 %979 }
 0x405   : > { %v983_v30 = vadd.f32 %v982_v27, %v980_v28  ;;  %v958_v42 = vadd.f32 %v1313_v33, %v957_v38 }
 0x407   : > { %v1177_v32 = vmul.f32 -1.442695, %v983_v30  ;;  %v962_v48 = vsel %vm961_vm11, %v1313_v33, %v958_v42 }
 0x408   : > { %v967_v49 = vsel %vm964_vm12, %v966_v47, %v962_v48 }
 0x409   : > { %1314 = vpow2.f32 %v1177_v32  ;;  %v970_v50 = vrot.slane %v967_v49, 1 }
 0x40b   : > { %v972_v53 = vadd.f32 %v970_v50, %v967_v49 }
 0x40d   : > { %v1006_v59 = vmul.f32 %v1005_v56, %v972_v53 }
 0x40f   : > { %v1315_v34 = vpop.eup %1314  ;;  %v1007_v0 = vperm.slane %v1006_v59, 0 }
 0x410   : > { %v987_v36 = vadd.f32 1.0, %v1315_v34 }
 0x411   : > { %v1008_v2 = vmul.f32 %v1007_v0, %v1766_v4 }
 0x412   : > { %1316 = vrcp.f32 %v987_v36  ;;  %vm993_vm13 = vweird.f32 %v987_v36  ;;  %v999_v52 = vand.u32 2147483648, %v987_v36  ;;  %v997_v55 = vand.u32 2147483647, %v987_v36 }
 0x414   : > { %v1000_v57 = vor.u32 1.1754944e-38, %v999_v52  ;;  %vm998_vm2 = vcmp.eq.f32.partialorder %v997_v55, 8.507059e+37 }
 0x418   : > { %v1317_v39 = vpop.eup %1316 }
 0x419   : > { %v989_v46 = vmul.f32 %v1317_v39, %v987_v36  ;;  %vm994_vm14 = vweird.f32 %v1317_v39 }
 0x41a   : > { %vm995_vm15 = vmor %vm993_vm13, %vm994_vm14 }
 0x41b   : > { %v990_v40 = vsub.f32 1.0, %v989_v46 }
 0x41d   : > { %v991_v51 = vmul.f32 %v1317_v39, %v990_v40 }
 0x41f   : > { %v992_v54 = vadd.f32 %v1317_v39, %v991_v51 }
 0x421   : > { %v996_v58 = vsel %vm995_vm15, %v1317_v39, %v992_v54 }
 0x422   : > { %v1001_v61 = vsel %vm998_vm2, %v1000_v57, %v996_v58 }
 0x423   : > { %v1011_v1 = vmul.f32 %v1010_v62, %v1001_v61 }
 0x425   : > { %v1012_v5 = vmul.f32 %v1011_v1, %v1766_v4 }
 0x461   : > { %v858_v60 = vpop.f32.mrf.mxu1 }
 0x462   : > { %v859_v43 = vadd.f32 %v1291_v63, %v858_v60 }
 0x464   : > { %v1009_v3 = vadd.f32 %v1008_v2, %v859_v43 }
 0x466   : > { %v1013_v6 = vadd.f32 %v1012_v5, %v1009_v3 }
 0x468   : > { %1014 = vst.msk [vmem:[%s463_s12] sm:$0xff] %vm473_vm0, %v1013_v6 }
 0x469   : > { %1480 = shalt.err (!%p1477_p9)
}
 0x46a   : > { %1201 = dma.vmem_to_hbm [thread:$0]  (%p1701_p5), %s1029_s22, 128, %s1031_s26, %s1016_s24  }
 0x46b PF: > { %s1042_s28 = sand.u32 1, %s1519_s17   ;;  %p1946_p10 = scmp.ge.s32.totalorder %s1531_s20, 2 }
 0x46c   : > { %s1043_s15 = scalar_lea.sflag [#allocation4], %s1042_s28 }
 0x46d   : > { %p1221_p13 = pnand %p1946_p10, %p1705_p6 }
 0x46f   : > { %p1222_p11 = pneg %p1221_p13 }
 0x471   : > { %1514 = dma.done.wait (%p1222_p11), %s1043_s15, 128  }
 0x472   : > { %1516 = vsyncadd (%p1222_p11), %s1043_s15, 4294967168  ;;  %s1947_s3 = sld [smem:[#allocation18_spill]]  ;;  %p27_p0 = scmp.ge.s32.totalorder %s1675_s16, 4  }
 0x473   : > { %s1948_s19 = sld [smem:[#allocation19_spill]]  ;;  %s1949_s17 = smov %s1523_s18 }
 0x474   : > { %s1951_s20 = smov %s1675_s16  ;;  %29 = sbr.rel (!%p27_p0) target bundleno = 13 (0xd), region = 126 }
 0x478   : > { %s1950_s18 = smov %s1947_s3 }
 0x479   :  { %1049 = vsyncpa [#allocation3], 1 }
 0x47a   :  { %1051 = vsyncpa [#allocation3 + $0x1], 1 }
 0x47b   :  { %1052 = vsyncpa [#allocation8], 1 }
 0x47c   :  { %1053 = vsyncpa [#allocation11], 1 }
 0x47d   :  { %1054 = vsyncpa [#allocation4], 1 }
 0x47e   :  { %1056 = vsyncpa [#allocation4 + $0x1], 1 }
 0x47f   :  { %1057 = vsyncpa [#allocation5], 1 }
 0x480   :  { %1059 = vsyncpa [#allocation5 + $0x1], 1 }

</bundles_post_ra>
